<compile_context>
chip_gen: v7x
topology: tpu7x:2x2x1
jax: 0.10.0
libtpu: 0.0.40
codegen_flags: <defaults>
</compile_context>

<pallas_src>
import functools

import jax
import jax.numpy as jnp
from jax.experimental import pallas as pl
from jax.experimental.pallas import tpu as pltpu


def _round_up(x, m):
    return ((x + m - 1) // m) * m


def _ntxent_kernel(zi_row_ref, zj_col_ref, zj_row_ref, zi_col_ref,   # inputs
                   lse_a_ref, lse_b_ref, diag_ref,                   # outputs
                   m_a, l_a, m_b, l_b,                               # scratch
                   *, inv_t, temperature, n_valid, col_tile, mask_cols,
                   mm_dtype):
    k = pl.program_id(1)
    nk = pl.num_programs(1)

    @pl.when(k == 0)
    def _init():
        m_a[...] = jnp.full_like(m_a, -jnp.inf)
        l_a[...] = jnp.zeros_like(l_a)
        m_b[...] = jnp.full_like(m_b, -jnp.inf)
        l_b[...] = jnp.zeros_like(l_b)

    eps_sq = jnp.float32(1e-24)  # (F.normalize eps = 1e-12)^2

    def _normalize(x, scale):
        x = x.astype(jnp.float32)
        ssq = jnp.sum(x * x, axis=-1, keepdims=True)
        return x * (jax.lax.rsqrt(jnp.maximum(ssq, eps_sq)) * jnp.float32(scale))

    # Row blocks carry the 1/temperature scale (folded into the normalization
    # multiply); column blocks are plain L2-normalized.
    zi_r = _normalize(zi_row_ref[...], inv_t)   # rows of sim       (scaled)
    zj_r = _normalize(zj_row_ref[...], inv_t)   # rows of sim.T     (scaled)
    zj_c = _normalize(zj_col_ref[...], 1.0)     # cols of sim
    zi_c = _normalize(zi_col_ref[...], 1.0)     # cols of sim.T

    # MXU matmuls: contraction on last dims, no explicit transpose.
    dn = (((1,), (1,)), ((), ()))
    sim_a = jax.lax.dot_general(zi_r.astype(mm_dtype), zj_c.astype(mm_dtype),
                                dn, preferred_element_type=jnp.float32)
    sim_b = jax.lax.dot_general(zj_r.astype(mm_dtype), zi_c.astype(mm_dtype),
                                dn, preferred_element_type=jnp.float32)

    if mask_cols:  # static: only compiled when N was padded up to the tile size
        col = k * col_tile + jax.lax.broadcasted_iota(jnp.int32, sim_a.shape, 1)
        valid = col < n_valid
        neg = jnp.float32(-1e30)
        sim_a = jnp.where(valid, sim_a, neg)
        sim_b = jnp.where(valid, sim_b, neg)

    def _online_lse(sim, m_ref, l_ref):
        m_prev = m_ref[...]
        m_new = jnp.maximum(m_prev, jnp.max(sim, axis=-1, keepdims=True))
        l_ref[...] = (l_ref[...] * jnp.exp(m_prev - m_new)
                      + jnp.sum(jnp.exp(sim - m_new), axis=-1, keepdims=True))
        m_ref[...] = m_new

    _online_lse(sim_a, m_a, l_a)
    _online_lse(sim_b, m_b, l_b)

    @pl.when(k == nk - 1)
    def _finalize():
        lse_a_ref[...] = m_a[...] + jnp.log(l_a[...])
        lse_b_ref[...] = m_b[...] + jnp.log(l_b[...])
        # Correct-class logit: sim[r, r] = (zi_n[r] . zj_n[r]) / temperature.
        # zi_r and zj_r each carry 1/temperature, so multiply back once.
        diag_ref[...] = jnp.float32(temperature) * jnp.sum(
            zi_r * zj_r, axis=-1, keepdims=True)


def ntxent_loss(z_i, z_j, temperature=1.0, *, block=256,
                mm_dtype=jnp.float32):
    """Pallas-TPU NT-Xent loss. z_i, z_j: (N, D). Returns scalar f32."""
    assert z_i.shape == z_j.shape and z_i.ndim == 2
    n, d = z_i.shape
    inv_t = 1.0 / float(temperature)

    # Lane-pad D to a multiple of 128 (zero pad: norms and dots unchanged).
    dp = _round_up(max(d, 1), 128)
    # One tile size for both grid axes so a single padded N works everywhere.
    t = min(_round_up(block, 8), _round_up(n, 8))
    n_pad = _round_up(n, t)

    if (n_pad, dp) != (n, d):
        pad = ((0, n_pad - n), (0, dp - d))
        z_i = jnp.pad(z_i, pad)
        z_j = jnp.pad(z_j, pad)

    grid = (n_pad // t, n_pad // t)
    mask_cols = n_pad != n

    kernel = functools.partial(
        _ntxent_kernel,
        inv_t=inv_t, temperature=float(temperature), n_valid=n,
        col_tile=t, mask_cols=mask_cols, mm_dtype=mm_dtype)

    row_spec = pl.BlockSpec((t, dp), lambda i, k: (i, 0))
    col_spec = pl.BlockSpec((t, dp), lambda i, k: (k, 0))
    out_spec = pl.BlockSpec((t, 1), lambda i, k: (i, 0))
    out_sds = jax.ShapeDtypeStruct((n_pad, 1), jnp.float32)

    lse_a, lse_b, diag = pl.pallas_call(
        kernel,
        out_shape=(out_sds, out_sds, out_sds),
        grid_spec=pltpu.PrefetchScalarGridSpec(
            num_scalar_prefetch=0,
            grid=grid,
            in_specs=[row_spec, col_spec, row_spec, col_spec],
            out_specs=(out_spec, out_spec, out_spec),
            scratch_shapes=[pltpu.VMEM((t, 1), jnp.float32)
                            for _ in range(4)],
        ),
        compiler_params=pltpu.CompilerParams(
            dimension_semantics=("parallel", "arbitrary"),
            vmem_limit_bytes=48 * 1024 * 1024),
    )(z_i, z_j, z_j, z_i)

    # Tiny O(N) epilogue: drop padded rows and combine the three per-row terms.
    lse_a = lse_a[:n, 0]
    lse_b = lse_b[:n, 0]
    diag = diag[:n, 0]
    return (jnp.sum(lse_a) + jnp.sum(lse_b) - 2.0 * jnp.sum(diag)) / (2.0 * n)


def _ntxent_ref(z_i, z_j, temperature=1.0):
    """Plain-JAX reference mirroring the PyTorch forward."""
    z_i = z_i / jnp.maximum(jnp.linalg.norm(z_i, axis=-1, keepdims=True), 1e-12)
    z_j = z_j / jnp.maximum(jnp.linalg.norm(z_j, axis=-1, keepdims=True), 1e-12)
    sim = (z_i @ z_j.T) / temperature
    logits = jnp.concatenate([sim, sim.T], axis=0)
    n = z_i.shape[0]
    labels = jnp.concatenate([jnp.arange(n), jnp.arange(n)])
    lse = jax.scipy.special.logsumexp(logits, axis=-1)
    correct = logits[jnp.arange(2 * n), labels]
    return jnp.mean(lse - correct)


if __name__ == "__main__":
    base_key = jax.random.PRNGKey(0)

    def check(n, d, temp, block=256, mm_dtype=jnp.float32, tol=1e-4):
        k1, k2 = jax.random.split(jax.random.fold_in(base_key, n * 1000 + d))
        z_i = jax.random.normal(k1, (n, d), dtype=jnp.float32)
        z_j = jax.random.normal(k2, (n, d), dtype=jnp.float32)
        out = ntxent_loss(z_i, z_j, temp, block=block, mm_dtype=mm_dtype)
        out = jax.block_until_ready(out)
        ref = _ntxent_ref(z_i, z_j, temp)
        assert jnp.allclose(out, ref, atol=tol, rtol=tol), (n, d, temp, out, ref)

    # Primary small case (batch=8, hidden=32) matching the module's toy shapes.
    check(8, 32, 0.5)
    # Padded case: N not a multiple of the tile, D not a multiple of 128
    # (exercises the in-kernel column mask + row slice-off).
    check(12, 40, 1.0)
    # Multi-tile grid: online LSE across several column tiles, 2x2 grid.
    check(64, 128, 0.1, block=32)
    # bf16 MXU operands (v6e/v7x fast path), f32 accumulation; looser tolerance.
    check(64, 128, 0.5, block=32, mm_dtype=jnp.bfloat16, tol=2e-2)

    print("KERNEL_OK")
</pallas_src>

<mosaic_0001>
module attributes {stable_mosaic.version = 11 : i64} {
  func.func @_ntxent_kernel(%arg0: i32, %arg1: i32, %arg2: memref<8x128xf32, #tpu.memory_space<vmem>>, %arg3: memref<8x128xf32, #tpu.memory_space<vmem>>, %arg4: memref<8x128xf32, #tpu.memory_space<vmem>>, %arg5: memref<8x128xf32, #tpu.memory_space<vmem>>, %arg6: memref<8x1xf32, #tpu.memory_space<vmem>>, %arg7: memref<8x1xf32, #tpu.memory_space<vmem>>, %arg8: memref<8x1xf32, #tpu.memory_space<vmem>>, %arg9: memref<8x1xf32, #tpu.memory_space<vmem>>, %arg10: memref<8x1xf32, #tpu.memory_space<vmem>>, %arg11: memref<8x1xf32, #tpu.memory_space<vmem>>, %arg12: memref<8x1xf32, #tpu.memory_space<vmem>>) attributes {dimension_semantics = [#tpu.dimension_semantics<parallel>, #tpu.dimension_semantics<arbitrary>], iteration_bounds = array<i64: 1, 1>, scalar_prefetch = 0 : i64, scratch_operands = 4 : i64, tpu.core_type = #tpu.core_type<tc>, window_params = [{transform_indices = @transform_0, window_bounds = array<i64: 8, 128>}, {transform_indices = @transform_1, window_bounds = array<i64: 8, 128>}, {transform_indices = @transform_2, window_bounds = array<i64: 8, 128>}, {transform_indices = @transform_3, window_bounds = array<i64: 8, 128>}, {transform_indices = @transform_4, window_bounds = array<i64: 8, 1>}, {transform_indices = @transform_5, window_bounds = array<i64: 8, 1>}, {transform_indices = @transform_6, window_bounds = array<i64: 8, 1>}]} {
    %c0_i32 = arith.constant 0 : i32
    %0 = arith.cmpi eq, %arg1, %c0_i32 : i32
    %1 = arith.extui %0 : i1 to i32
    %c0_i32_0 = arith.constant 0 : i32
    %2 = arith.cmpi ne, %1, %c0_i32_0 : i32
    scf.if %2 {
      %cst_43 = arith.constant 0xFF800000 : f32
      %84 = vector.broadcast %cst_43 : f32 to vector<8x1xf32>
      %c0_44 = arith.constant 0 : index
      %c0_45 = arith.constant 0 : index
      %85 = vector.load %arg9[%c0_44, %c0_45] : memref<8x1xf32, #tpu.memory_space<vmem>>, vector<8x1xf32>
      tpu.vector_store %arg9[%c0_44, %c0_45], %84 {strides = array<i32>} : memref<8x1xf32, #tpu.memory_space<vmem>>, vector<8x1xf32>,
      %cst_46 = arith.constant 0.000000e+00 : f32
      %86 = vector.broadcast %cst_46 : f32 to vector<8x1xf32>
      %c0_47 = arith.constant 0 : index
      %c0_48 = arith.constant 0 : index
      %87 = vector.load %arg10[%c0_47, %c0_48] : memref<8x1xf32, #tpu.memory_space<vmem>>, vector<8x1xf32>
      tpu.vector_store %arg10[%c0_47, %c0_48], %86 {strides = array<i32>} : memref<8x1xf32, #tpu.memory_space<vmem>>, vector<8x1xf32>,
      %cst_49 = arith.constant 0xFF800000 : f32
      %88 = vector.broadcast %cst_49 : f32 to vector<8x1xf32>
      %c0_50 = arith.constant 0 : index
      %c0_51 = arith.constant 0 : index
      %89 = vector.load %arg11[%c0_50, %c0_51] : memref<8x1xf32, #tpu.memory_space<vmem>>, vector<8x1xf32>
      tpu.vector_store %arg11[%c0_50, %c0_51], %88 {strides = array<i32>} : memref<8x1xf32, #tpu.memory_space<vmem>>, vector<8x1xf32>,
      %cst_52 = arith.constant 0.000000e+00 : f32
      %90 = vector.broadcast %cst_52 : f32 to vector<8x1xf32>
      %c0_53 = arith.constant 0 : index
      %c0_54 = arith.constant 0 : index
      %91 = vector.load %arg12[%c0_53, %c0_54] : memref<8x1xf32, #tpu.memory_space<vmem>>, vector<8x1xf32>
      tpu.vector_store %arg12[%c0_53, %c0_54], %90 {strides = array<i32>} : memref<8x1xf32, #tpu.memory_space<vmem>>, vector<8x1xf32>,
    } else {
    }
    %c0 = arith.constant 0 : index
    %c0_1 = arith.constant 0 : index
    %3 = vector.load %arg2[%c0, %c0_1] : memref<8x128xf32, #tpu.memory_space<vmem>>, vector<8x128xf32>
    %4 = arith.mulf %3, %3 : vector<8x128xf32>
    %cst = arith.constant dense<0.000000e+00> : vector<8xf32>
    %5 = vector.multi_reduction <add>, %4, %cst [1] : vector<8x128xf32> to vector<8xf32>
    %6 = vector.shape_cast %5 : vector<8xf32> to vector<8x1xf32>
    %cst_2 = arith.constant 1.000000e-24 : f32
    %7 = vector.broadcast %cst_2 : f32 to vector<8x1xf32>
    %8 = arith.maximumf %6, %7 : vector<8x1xf32>
    %9 = math.rsqrt %8 : vector<8x1xf32>
    %cst_3 = arith.constant 2.000000e+00 : f32
    %10 = vector.broadcast %cst_3 : f32 to vector<8x1xf32>
    %11 = arith.mulf %9, %10 : vector<8x1xf32>
    %12 = vector.broadcast %11 : vector<8x1xf32> to vector<8x128xf32>
    %13 = arith.mulf %3, %12 : vector<8x128xf32>
    %c0_4 = arith.constant 0 : index
    %c0_5 = arith.constant 0 : index
    %14 = vector.load %arg4[%c0_4, %c0_5] : memref<8x128xf32, #tpu.memory_space<vmem>>, vector<8x128xf32>
    %15 = arith.mulf %14, %14 : vector<8x128xf32>
    %cst_6 = arith.constant dense<0.000000e+00> : vector<8xf32>
    %16 = vector.multi_reduction <add>, %15, %cst_6 [1] : vector<8x128xf32> to vector<8xf32>
    %17 = vector.shape_cast %16 : vector<8xf32> to vector<8x1xf32>
    %cst_7 = arith.constant 1.000000e-24 : f32
    %18 = vector.broadcast %cst_7 : f32 to vector<8x1xf32>
    %19 = arith.maximumf %17, %18 : vector<8x1xf32>
    %20 = math.rsqrt %19 : vector<8x1xf32>
    %cst_8 = arith.constant 2.000000e+00 : f32
    %21 = vector.broadcast %cst_8 : f32 to vector<8x1xf32>
    %22 = arith.mulf %20, %21 : vector<8x1xf32>
    %23 = vector.broadcast %22 : vector<8x1xf32> to vector<8x128xf32>
    %24 = arith.mulf %14, %23 : vector<8x128xf32>
    %c0_9 = arith.constant 0 : index
    %c0_10 = arith.constant 0 : index
    %25 = vector.load %arg3[%c0_9, %c0_10] : memref<8x128xf32, #tpu.memory_space<vmem>>, vector<8x128xf32>
    %26 = arith.mulf %25, %25 : vector<8x128xf32>
    %cst_11 = arith.constant dense<0.000000e+00> : vector<8xf32>
    %27 = vector.multi_reduction <add>, %26, %cst_11 [1] : vector<8x128xf32> to vector<8xf32>
    %28 = vector.shape_cast %27 : vector<8xf32> to vector<8x1xf32>
    %cst_12 = arith.constant 1.000000e-24 : f32
    %29 = vector.broadcast %cst_12 : f32 to vector<8x1xf32>
    %30 = arith.maximumf %28, %29 : vector<8x1xf32>
    %31 = math.rsqrt %30 : vector<8x1xf32>
    %cst_13 = arith.constant 1.000000e+00 : f32
    %32 = vector.broadcast %cst_13 : f32 to vector<8x1xf32>
    %33 = arith.mulf %31, %32 : vector<8x1xf32>
    %34 = vector.broadcast %33 : vector<8x1xf32> to vector<8x128xf32>
    %35 = arith.mulf %25, %34 : vector<8x128xf32>
    %c0_14 = arith.constant 0 : index
    %c0_15 = arith.constant 0 : index
    %36 = vector.load %arg5[%c0_14, %c0_15] : memref<8x128xf32, #tpu.memory_space<vmem>>, vector<8x128xf32>
    %37 = arith.mulf %36, %36 : vector<8x128xf32>
    %cst_16 = arith.constant dense<0.000000e+00> : vector<8xf32>
    %38 = vector.multi_reduction <add>, %37, %cst_16 [1] : vector<8x128xf32> to vector<8xf32>
    %39 = vector.shape_cast %38 : vector<8xf32> to vector<8x1xf32>
    %cst_17 = arith.constant 1.000000e-24 : f32
    %40 = vector.broadcast %cst_17 : f32 to vector<8x1xf32>
    %41 = arith.maximumf %39, %40 : vector<8x1xf32>
    %42 = math.rsqrt %41 : vector<8x1xf32>
    %cst_18 = arith.constant 1.000000e+00 : f32
    %43 = vector.broadcast %cst_18 : f32 to vector<8x1xf32>
    %44 = arith.mulf %42, %43 : vector<8x1xf32>
    %45 = vector.broadcast %44 : vector<8x1xf32> to vector<8x128xf32>
    %46 = arith.mulf %36, %45 : vector<8x128xf32>
    %cst_19 = arith.constant dense<0.000000e+00> : vector<8x8xf32>
    %47 = tpu.matmul %13, %35, %cst_19 {dimension_numbers = #tpu.dot_dimension_numbers<[1], [1], [0], [0], [0, 0, 1, 0], [], []>} : vector<8x128xf32>, vector<8x128xf32>, vector<8x8xf32> -> vector<8x8xf32>
    %cst_20 = arith.constant dense<0.000000e+00> : vector<8x8xf32>
    %48 = tpu.matmul %24, %46, %cst_20 {dimension_numbers = #tpu.dot_dimension_numbers<[1], [1], [0], [0], [0, 0, 1, 0], [], []>} : vector<8x128xf32>, vector<8x128xf32>, vector<8x8xf32> -> vector<8x8xf32>
    %c0_21 = arith.constant 0 : index
    %c0_22 = arith.constant 0 : index
    %49 = vector.load %arg9[%c0_21, %c0_22] : memref<8x1xf32, #tpu.memory_space<vmem>>, vector<8x1xf32>
    %cst_23 = arith.constant dense<0xFF800000> : vector<8xf32>
    %50 = vector.multi_reduction <maximumf>, %47, %cst_23 [1] : vector<8x8xf32> to vector<8xf32>
    %51 = vector.shape_cast %50 : vector<8xf32> to vector<8x1xf32>
    %52 = arith.maximumf %49, %51 : vector<8x1xf32>
    %c0_24 = arith.constant 0 : index
    %c0_25 = arith.constant 0 : index
    %53 = vector.load %arg10[%c0_24, %c0_25] : memref<8x1xf32, #tpu.memory_space<vmem>>, vector<8x1xf32>
    %54 = arith.subf %49, %52 : vector<8x1xf32>
    %55 = math.exp %54 : vector<8x1xf32>
    %56 = arith.mulf %53, %55 : vector<8x1xf32>
    %57 = vector.broadcast %52 : vector<8x1xf32> to vector<8x8xf32>
    %58 = arith.subf %47, %57 : vector<8x8xf32>
    %59 = math.exp %58 : vector<8x8xf32>
    %cst_26 = arith.constant dense<0.000000e+00> : vector<8xf32>
    %60 = vector.multi_reduction <add>, %59, %cst_26 [1] : vector<8x8xf32> to vector<8xf32>
    %61 = vector.shape_cast %60 : vector<8xf32> to vector<8x1xf32>
    %62 = arith.addf %56, %61 : vector<8x1xf32>
    %c0_27 = arith.constant 0 : index
    %c0_28 = arith.constant 0 : index
    %63 = vector.load %arg10[%c0_27, %c0_28] : memref<8x1xf32, #tpu.memory_space<vmem>>, vector<8x1xf32>
    tpu.vector_store %arg10[%c0_27, %c0_28], %62 {strides = array<i32>} : memref<8x1xf32, #tpu.memory_space<vmem>>, vector<8x1xf32>,
    %c0_29 = arith.constant 0 : index
    %c0_30 = arith.constant 0 : index
    %64 = vector.load %arg9[%c0_29, %c0_30] : memref<8x1xf32, #tpu.memory_space<vmem>>, vector<8x1xf32>
    tpu.vector_store %arg9[%c0_29, %c0_30], %52 {strides = array<i32>} : memref<8x1xf32, #tpu.memory_space<vmem>>, vector<8x1xf32>,
    %c0_31 = arith.constant 0 : index
    %c0_32 = arith.constant 0 : index
    %65 = vector.load %arg11[%c0_31, %c0_32] : memref<8x1xf32, #tpu.memory_space<vmem>>, vector<8x1xf32>
    %cst_33 = arith.constant dense<0xFF800000> : vector<8xf32>
    %66 = vector.multi_reduction <maximumf>, %48, %cst_33 [1] : vector<8x8xf32> to vector<8xf32>
    %67 = vector.shape_cast %66 : vector<8xf32> to vector<8x1xf32>
    %68 = arith.maximumf %65, %67 : vector<8x1xf32>
    %c0_34 = arith.constant 0 : index
    %c0_35 = arith.constant 0 : index
    %69 = vector.load %arg12[%c0_34, %c0_35] : memref<8x1xf32, #tpu.memory_space<vmem>>, vector<8x1xf32>
    %70 = arith.subf %65, %68 : vector<8x1xf32>
    %71 = math.exp %70 : vector<8x1xf32>
    %72 = arith.mulf %69, %71 : vector<8x1xf32>
    %73 = vector.broadcast %68 : vector<8x1xf32> to vector<8x8xf32>
    %74 = arith.subf %48, %73 : vector<8x8xf32>
    %75 = math.exp %74 : vector<8x8xf32>
    %cst_36 = arith.constant dense<0.000000e+00> : vector<8xf32>
    %76 = vector.multi_reduction <add>, %75, %cst_36 [1] : vector<8x8xf32> to vector<8xf32>
    %77 = vector.shape_cast %76 : vector<8xf32> to vector<8x1xf32>
    %78 = arith.addf %72, %77 : vector<8x1xf32>
    %c0_37 = arith.constant 0 : index
    %c0_38 = arith.constant 0 : index
    %79 = vector.load %arg12[%c0_37, %c0_38] : memref<8x1xf32, #tpu.memory_space<vmem>>, vector<8x1xf32>
    tpu.vector_store %arg12[%c0_37, %c0_38], %78 {strides = array<i32>} : memref<8x1xf32, #tpu.memory_space<vmem>>, vector<8x1xf32>,
    %c0_39 = arith.constant 0 : index
    %c0_40 = arith.constant 0 : index
    %80 = vector.load %arg11[%c0_39, %c0_40] : memref<8x1xf32, #tpu.memory_space<vmem>>, vector<8x1xf32>
    tpu.vector_store %arg11[%c0_39, %c0_40], %68 {strides = array<i32>} : memref<8x1xf32, #tpu.memory_space<vmem>>, vector<8x1xf32>,
    %c0_i32_41 = arith.constant 0 : i32
    %81 = arith.cmpi eq, %arg1, %c0_i32_41 : i32
    %82 = arith.extui %81 : i1 to i32
    %c0_i32_42 = arith.constant 0 : i32
    %83 = arith.cmpi ne, %82, %c0_i32_42 : i32
    scf.if %83 {
      %c0_43 = arith.constant 0 : index
      %c0_44 = arith.constant 0 : index
      %84 = vector.load %arg9[%c0_43, %c0_44] : memref<8x1xf32, #tpu.memory_space<vmem>>, vector<8x1xf32>
      %c0_45 = arith.constant 0 : index
      %c0_46 = arith.constant 0 : index
      %85 = vector.load %arg10[%c0_45, %c0_46] : memref<8x1xf32, #tpu.memory_space<vmem>>, vector<8x1xf32>
      %86 = math.log %85 : vector<8x1xf32>
      %87 = arith.addf %84, %86 : vector<8x1xf32>
      %c0_47 = arith.constant 0 : index
      %c0_48 = arith.constant 0 : index
      %88 = vector.load %arg6[%c0_47, %c0_48] : memref<8x1xf32, #tpu.memory_space<vmem>>, vector<8x1xf32>
      tpu.vector_store %arg6[%c0_47, %c0_48], %87 {strides = array<i32>} : memref<8x1xf32, #tpu.memory_space<vmem>>, vector<8x1xf32>,
      %c0_49 = arith.constant 0 : index
      %c0_50 = arith.constant 0 : index
      %89 = vector.load %arg11[%c0_49, %c0_50] : memref<8x1xf32, #tpu.memory_space<vmem>>, vector<8x1xf32>
      %c0_51 = arith.constant 0 : index
      %c0_52 = arith.constant 0 : index
      %90 = vector.load %arg12[%c0_51, %c0_52] : memref<8x1xf32, #tpu.memory_space<vmem>>, vector<8x1xf32>
      %91 = math.log %90 : vector<8x1xf32>
      %92 = arith.addf %89, %91 : vector<8x1xf32>
      %c0_53 = arith.constant 0 : index
      %c0_54 = arith.constant 0 : index
      %93 = vector.load %arg7[%c0_53, %c0_54] : memref<8x1xf32, #tpu.memory_space<vmem>>, vector<8x1xf32>
      tpu.vector_store %arg7[%c0_53, %c0_54], %92 {strides = array<i32>} : memref<8x1xf32, #tpu.memory_space<vmem>>, vector<8x1xf32>,
      %94 = arith.mulf %13, %24 : vector<8x128xf32>
      %cst_55 = arith.constant dense<0.000000e+00> : vector<8xf32>
      %95 = vector.multi_reduction <add>, %94, %cst_55 [1] : vector<8x128xf32> to vector<8xf32>
      %96 = vector.shape_cast %95 : vector<8xf32> to vector<8x1xf32>
      %cst_56 = arith.constant 5.000000e-01 : f32
      %97 = vector.broadcast %cst_56 : f32 to vector<8x1xf32>
      %98 = arith.mulf %97, %96 : vector<8x1xf32>
      %c0_57 = arith.constant 0 : index
      %c0_58 = arith.constant 0 : index
      %99 = vector.load %arg8[%c0_57, %c0_58] : memref<8x1xf32, #tpu.memory_space<vmem>>, vector<8x1xf32>
      tpu.vector_store %arg8[%c0_57, %c0_58], %98 {strides = array<i32>} : memref<8x1xf32, #tpu.memory_space<vmem>>, vector<8x1xf32>,
    } else {
    }
    return
  }
  func.func @transform_0(%arg0: i32, %arg1: i32) -> (i32, i32) {
    %c0_i32 = arith.constant 0 : i32
    %c0_i32_0 = arith.constant 0 : i32
    return %arg0, %c0_i32 : i32, i32
  }
  func.func @transform_1(%arg0: i32, %arg1: i32) -> (i32, i32) {
    %c0_i32 = arith.constant 0 : i32
    %c0_i32_0 = arith.constant 0 : i32
    return %arg1, %c0_i32 : i32, i32
  }
  func.func @transform_2(%arg0: i32, %arg1: i32) -> (i32, i32) {
    %c0_i32 = arith.constant 0 : i32
    %c0_i32_0 = arith.constant 0 : i32
    return %arg0, %c0_i32 : i32, i32
  }
  func.func @transform_3(%arg0: i32, %arg1: i32) -> (i32, i32) {
    %c0_i32 = arith.constant 0 : i32
    %c0_i32_0 = arith.constant 0 : i32
    return %arg1, %c0_i32 : i32, i32
  }
  func.func @transform_4(%arg0: i32, %arg1: i32) -> (i32, i32) {
    %c0_i32 = arith.constant 0 : i32
    %c0_i32_0 = arith.constant 0 : i32
    return %arg0, %c0_i32 : i32, i32
  }
  func.func @transform_5(%arg0: i32, %arg1: i32) -> (i32, i32) {
    %c0_i32 = arith.constant 0 : i32
    %c0_i32_0 = arith.constant 0 : i32
    return %arg0, %c0_i32 : i32, i32
  }
  func.func @transform_6(%arg0: i32, %arg1: i32) -> (i32, i32) {
    %c0_i32 = arith.constant 0 : i32
    %c0_i32_0 = arith.constant 0 : i32
    return %arg0, %c0_i32 : i32, i32
  }
}

</mosaic_0001>

<bundles_post_ra>
// kernel: tpu_custom_call.1
= control target key start
LH: loop header
LB: loop body
LE: loop exit
PB: predicated region body
PF: predicated region fallthrough
CT: control target
= control target key end

     0   :  { %12 = vsyncpa [#allocation7], 0  ;;  %s536_s0 = inlined_call_operand.hbm [shape: f32[8,128], index: 0, kind: input, shape index: {}]   ;;  %s537_s1 = inlined_call_operand.hbm [shape: f32[8,128], index: 1, kind: input, shape index: {}]   ;;  %s538_s2 = inlined_call_operand.hbm [shape: f32[8,128], index: 2, kind: input, shape index: {}]   ;;  %s539_s3 = inlined_call_operand.vmem [shape: f32[8,128], index: 3, kind: input, shape index: {}]   ;;  %s540_s4 = inlined_call_operand.vmem [shape: f32[8,1], index: 4, kind: output, shape index: {0}]   ;;  %s541_s5 = inlined_call_operand.vmem [shape: f32[8,1], index: 5, kind: output, shape index: {1}]   ;;  %s542_s6 = inlined_call_operand.vmem [shape: f32[8,1], index: 6, kind: output, shape index: {2}]  }
   0x1   :  { %13 = vsyncpa [#allocation9], 0  ;;  %s431_s21 = smov [#allocation8]   ;;  %s432_s23 = smov [#allocation6]  }
   0x2   :  { %s30_s22 = sshll.u32 %s431_s21, 4  ;;  %s20_s24 = sshll.u32 %s432_s23, 4  ;;  %s31_s22 = int_to_ptr.vmem [resolvable:$true] %s30_s22  ;;  %s21_s24 = int_to_ptr.vmem [resolvable:$true] %s20_s24 }
   0x3   :  { %s361_s27 = scalar_lea.hbm %s537_s1, 128 }
   0x4   :  { %p362_p0 = scmp.ne.s32.totalorder %s537_s1, %s361_s27  ;;  %p365_p1 = scmp.lt.u32.totalorder %s361_s27, %s537_s1 }
   0x6   :  { %p367_p2 = pnand %p365_p1, %p362_p0 }
   0x8   :  { %370 = shalt.err (!%p367_p2)
}
   0x9   :  { %s371_s8 = scalar_lea.vmem %s31_s22, 128  ;;  %p376_p4 = scmp.lt.s32.totalorder %s31_s22, %s31_s22 }
   0xa   :  { %p372_p3 = scmp.ne.s32.totalorder %s31_s22, %s371_s8  ;;  %p377_p5 = scmp.lt.s32.totalorder %s371_s8, %s371_s8 }
   0xc   :  { %p378_p6 = por %p377_p5, %p376_p4 }
   0xe   :  { %p379_p7 = pnand %p378_p6, %p372_p3 }
  0x10   :  { %382 = shalt.err (!%p379_p7)
}
  0x11   :  { %33 = dma.hbm_to_vmem [thread:$0]  %s537_s1, 128, %s31_s22, [#allocation9]  }
  0x12   :  { %s383_s13 = scalar_lea.hbm %s536_s0, 128 }
  0x13   :  { %p384_p8 = scmp.ne.s32.totalorder %s536_s0, %s383_s13  ;;  %p387_p9 = scmp.lt.u32.totalorder %s383_s13, %s536_s0 }
  0x15   :  { %p389_p10 = pnand %p387_p9, %p384_p8 }
  0x17   :  { %392 = shalt.err (!%p389_p10)
}
  0x18   :  { %s393_s18 = scalar_lea.vmem %s21_s24, 128  ;;  %p398_p12 = scmp.lt.s32.totalorder %s21_s24, %s21_s24 }
  0x19   :  { %p394_p11 = scmp.ne.s32.totalorder %s21_s24, %s393_s18  ;;  %p399_p13 = scmp.lt.s32.totalorder %s393_s18, %s393_s18 }
  0x1b   :  { %p400_p0 = por %p399_p13, %p398_p12 }
  0x1d   :  { %p401_p1 = pnand %p400_p0, %p394_p11 }
  0x1f   :  { %404 = shalt.err (!%p401_p1)
}
  0x20   :  { %23 = dma.hbm_to_vmem [thread:$0]  %s536_s0, 128, %s21_s24, [#allocation7]  }
  0x21   :  { %s433_s20 = smov [#allocation10]   ;;  %s405_s25 = scalar_lea.hbm %s538_s2, 128 }
  0x22   :  { %s40_s21 = sshll.u32 %s433_s20, 4  ;;  %p406_p2 = scmp.ne.s32.totalorder %s538_s2, %s405_s25  ;;  %s41_s21 = int_to_ptr.vmem [resolvable:$true] %s40_s21 }
  0x23   :  { %p409_p3 = scmp.lt.u32.totalorder %s405_s25, %s538_s2 }
  0x25   :  { %p411_p4 = pnand %p409_p3, %p406_p2 }
  0x27   :  { %414 = shalt.err (!%p411_p4)
}
  0x28   :  { %s415_s30 = scalar_lea.vmem %s41_s21, 128  ;;  %p420_p6 = scmp.lt.s32.totalorder %s41_s21, %s41_s21 }
  0x29   :  { %p416_p5 = scmp.ne.s32.totalorder %s41_s21, %s415_s30  ;;  %p421_p7 = scmp.lt.s32.totalorder %s415_s30, %s415_s30 }
  0x2b   :  { %p422_p8 = por %p421_p7, %p420_p6 }
  0x2d   :  { %p423_p9 = pnand %p422_p8, %p416_p5 }
  0x2f   :  { %426 = shalt.err (!%p423_p9)
}
  0x30   :  { %43 = dma.hbm_to_vmem [thread:$0]  %s538_s2, 128, %s41_s21, [#allocation9]  }
  0x31   :  { %427 = dma.done.wait [#allocation7], 128  }
  0x32   :  { %428 = vsyncadd [#allocation7], 4294967168 }
  0x33   :  { %429 = dma.done.wait [#allocation9], 256  }
  0x34   :  { %430 = vsyncadd [#allocation9], 4294967040  ;;  %v80_v0 = vld [vmem:[#allocation8] sm:$0xff]  ;;  %v64_v1 = vld [vmem:[#allocation6] sm:$0xff]  ;;  %v434_v8 = vmov 0.0   ;;  %vm435_vm0 = vmmov 0  }
  0x35   :  { %v87_v2 = vld [vmem:[%s539_s3] sm:$0xff]  ;;  %v81_v3 = vmul.f32 %v80_v0, %v80_v0  ;;  %v65_v4 = vmul.f32 %v64_v1, %v64_v1  ;;  %v72_v5 = vld [vmem:[#allocation10] sm:$0xff]  ;;  %322 = vmatprep.subr.mxu0 %v434_v8  ;;  %327 = vmatprep.subr.mxu1 %v434_v8  ;;  %vm59_vm1 = vcmask 7168   ;;  %v436_v28 = vmov -inf  }
  0x36   :  { %v88_v6 = vmul.f32 %v87_v2, %v87_v2  ;;  %v73_v7 = vmul.f32 %v72_v5, %v72_v5  ;;  %324 = vmatprep.mubr.msk.f32.mxu0 %vm435_vm0, %v434_v8  ;;  %329 = vmatprep.mubr.msk.f32.mxu1 %vm435_vm0, %v434_v8  ;;  %60 = vst.msk [vmem:[#allocation2] sm:$0xff] %vm59_vm1, %v436_v28  ;;  %61 = vst.msk [vmem:[#allocation3] sm:$0xff] %vm59_vm1, %v434_v8  ;;  %vm235_vm2 = vcmask 64512   ;;  %v437_v35 = vmov 0  }
  0x37   :  { %82 = vadd.xlane.f32.xlu0 %v81_v3  ;;  %66 = vadd.xlane.f32.xlu1 %v65_v4  ;;  %62 = vst.msk [vmem:[#allocation4] sm:$0xff] %vm59_vm1, %v436_v28  ;;  %63 = vst.msk [vmem:[#allocation5] sm:$0xff] %vm59_vm1, %v434_v8 }
  0x38   :  { %339 = vset.pattern.permute.xlu0 %v437_v35  ;;  %340 = vset.pattern.permute.xlu1 %v437_v35 }
  0x3b   :  { %89 = vadd.xlane.f32.xlu0 %v88_v6  ;;  %74 = vadd.xlane.f32.xlu1 %v73_v7 }
  0x3d   :  { %v234_v36 = vld [vmem:[#allocation2] sm:$0xff]  ;;  %v240_v57 = vld [vmem:[#allocation3] sm:$0xff] }
  0x3e   :  { %v260_v39 = vld [vmem:[#allocation4] sm:$0xff]  ;;  %v265_v61 = vld [vmem:[#allocation5] sm:$0xff] }
  0xc4   :  { %v83_v9 = vpop.xlane.xlu0 %82  ;;  %v67_v10 = vpop.xlane.xlu1 %66 }
  0xc5   :  { %v84_v11 = vmax.f32 %v83_v9, 1e-24  ;;  %v68_v12 = vmax.f32 %v67_v10, 1e-24 }
  0xc7   :  { %341 = vrsqrt.f32 %v84_v11 }
  0xc8   :  { %343 = vrsqrt.f32 %v68_v12  ;;  %v90_v13 = vpop.xlane.xlu0 %89  ;;  %v75_v14 = vpop.xlane.xlu1 %74 }
  0xc9   :  { %v91_v15 = vmax.f32 %v90_v13, 1e-24  ;;  %v76_v16 = vmax.f32 %v75_v14, 1e-24 }
  0xcb   :  { %345 = vrsqrt.f32 %v91_v15 }
  0xcc   :  { %347 = vrsqrt.f32 %v76_v16 }
  0xd1   :  { %v342_v17 = vpop.eup %341 }
  0xd2   :  { %v344_v18 = vpop.eup %343  ;;  %v86_v19 = vmul.f32 %v342_v17, %v80_v0 }
  0xd3   :  { %v70_v20 = vmul.f32 2.0, %v344_v18 }
  0xd4   :  { %323 = vmatpush3.xpose.msra.mxu0 %v86_v19 }
  0xd5   :  { %v346_v21 = vpop.eup %345  ;;  %v71_v22 = vmul.f32 %v70_v20, %v64_v1 }
  0xd6   :  { %v348_v23 = vpop.eup %347  ;;  %v93_v24 = vmul.f32 %v346_v21, %v87_v2 }
  0xd7   :  { %v78_v25 = vmul.f32 2.0, %v348_v23  ;;  %325 = vmatmul.mubr.f32.vlgmr.msra.gmra.mrb[0].mxu0 %v71_v22 }
  0xd8   :  { %328 = vmatpush3.xpose.msra.mxu1 %v93_v24 }
  0xd9   :  { %v79_v26 = vmul.f32 %v78_v25, %v72_v5 }
  0xdb   :  { %330 = vmatmul.mubr.f32.vlgmr.msra.gmra.mrb[0].mxu1 %v79_v26  ;;  %v299_v27 = vmul.f32 %v79_v26, %v71_v22 }
 0x1aa   :  { %v160_v29 = vpop.f32.mrb[0].mxu0 }
 0x1ab   :  { %v326_v30 = vpop.f32.mrb[1].mxu0  ;;  %v236_v31 = vsel %vm235_vm2, %v160_v29, -inf }
 0x1ac   :  { %237 = vmax.xlane.f32.xlu0 %v236_v31 }
 0x1ae   :  { %v230_v32 = vpop.f32.mrb[0].mxu1 }
 0x1af   :  { %v331_v33 = vpop.f32.mrb[1].mxu1  ;;  %v261_v34 = vsel %vm235_vm2, %v230_v32, -inf }
 0x1b0   :  { %262 = vmax.xlane.f32.xlu1 %v261_v34 }
 0x239   :  { %v238_v37 = vpop.xlane.xlu0 %237 }
 0x23a   :  { %v239_v38 = vmax.f32 %v234_v36, %v238_v37 }
 0x23c   :  { %v241_v40 = vsub.f32 %v234_v36, %v239_v38  ;;  %259 = vst.msk [vmem:[#allocation2] sm:$0xff] %vm59_vm1, %v239_v38  ;;  %247 = vperm.xlu0 %339, %v239_v38  }
 0x23d   :  { %v263_v41 = vpop.xlane.xlu1 %262 }
 0x23e   :  { %v264_v42 = vmax.f32 %v260_v39, %v263_v41  ;;  %v242_v54 = vmul.f32 1.442695, %v241_v40 }
 0x240   :  { %v266_v43 = vsub.f32 %v260_v39, %v264_v42  ;;  %283 = vst.msk [vmem:[#allocation4] sm:$0xff] %vm59_vm1, %v264_v42  ;;  %272 = vperm.xlu1 %340, %v264_v42  }
 0x242   :  { %v267_v55 = vmul.f32 1.442695, %v266_v43 }
 0x243   :  { %v287_v8 = vld [vmem:[#allocation2] sm:$0xff] }
 0x247   :  { %v293_v12 = vld [vmem:[#allocation4] sm:$0xff] }
 0x2bb   :  { %v248_v44 = vpop.permute.xlu0 %247 }
 0x2bc   :  { %v250_v45 = vsub.f32 %v160_v29, %v248_v44 }
 0x2be   :  { %v251_v46 = vmul.f32 1.442695, %v250_v45 }
 0x2bf   :  { %v273_v47 = vpop.permute.xlu1 %272 }
 0x2c0   :  { %349 = vpow2.f32 %v251_v46  ;;  %v275_v48 = vsub.f32 %v230_v32, %v273_v47 }
 0x2c2   :  { %v276_v49 = vmul.f32 1.442695, %v275_v48 }
 0x2c4   :  { %351 = vpow2.f32 %v276_v49 }
 0x2c5   :  { %353 = vpow2.f32 %v242_v54 }
 0x2c6   :  { %355 = vpow2.f32 %v267_v55 }
 0x2ca   :  { %v350_v50 = vpop.eup %349 }
 0x2cb   :  { %v253_v51 = vsel %vm235_vm2, %v350_v50, 0.0 }
 0x2cc   :  { %254 = vadd.xlane.f32.xlu1 %v253_v51 }
 0x2ce   :  { %v352_v52 = vpop.eup %351 }
 0x2cf   :  { %v278_v53 = vsel %vm235_vm2, %v352_v52, 0.0  ;;  %v354_v56 = vpop.eup %353 }
 0x2d0   :  { %279 = vadd.xlane.f32.xlu0 %v278_v53  ;;  %300 = vadd.xlane.f32.xlu1 %v299_v27  ;;  %v244_v58 = vmul.f32 %v354_v56, %v240_v57  ;;  %v356_v59 = vpop.eup %355 }
 0x2d1   :  { %v269_v63 = vmul.f32 %v356_v59, %v265_v61 }
 0x359   :  { %v255_v60 = vpop.xlane.xlu1 %254 }
 0x35a   :  { %v256_v62 = vadd.f32 %v255_v60, %v244_v58 }
 0x35c   :  { %258 = vst.msk [vmem:[#allocation3] sm:$0xff] %vm59_vm1, %v256_v62 }
 0x35d   :  { %v301_v0 = vpop.xlane.xlu1 %300  ;;  %v280_v1 = vpop.xlane.xlu0 %279 }
 0x35e   :  { %v302_v2 = vmul.f32 0.5, %v301_v0  ;;  %v281_v3 = vadd.f32 %v280_v1, %v269_v63 }
 0x360   :  { %303 = vst.msk [vmem:[%s542_s6] sm:$0xff] %vm59_vm1, %v302_v2  ;;  %282 = vst.msk [vmem:[#allocation5] sm:$0xff] %vm59_vm1, %v281_v3 }
 0x363   :  { %v288_v4 = vld [vmem:[#allocation3] sm:$0xff] }
 0x364   :  { %357 = vlog2.f32 %v288_v4 }
 0x367   :  { %v294_v5 = vld [vmem:[#allocation5] sm:$0xff] }
 0x368   :  { %359 = vlog2.f32 %v294_v5 }
 0x36e   :  { %v358_v6 = vpop.eup %357 }
 0x36f   :  { %v290_v7 = vmul.f32 0.6931472, %v358_v6 }
 0x371   :  { %v291_v9 = vadd.f32 %v290_v7, %v287_v8 }
 0x372   :  { %v360_v10 = vpop.eup %359 }
 0x373   :  { %292 = vst.msk [vmem:[%s540_s4] sm:$0xff] %vm59_vm1, %v291_v9  ;;  %v296_v11 = vmul.f32 0.6931472, %v360_v10 }
 0x375   :  { %v297_v13 = vadd.f32 %v296_v11, %v293_v12 }
 0x377   :  { %298 = vst.msk [vmem:[%s541_s5] sm:$0xff] %vm59_vm1, %v297_v13 }
 0x378   :  { %316 = vsyncpa [#allocation7], 1 }
 0x379   :  { %317 = vsyncpa [#allocation9], 1 }

</bundles_post_ra>
